<compile_context>
chip_gen: v6e
topology: v6e:2x2x1
jax: 0.10.0
libtpu: 0.0.40
codegen_flags: <defaults>
</compile_context>

<pallas_src>
import jax
import jax.numpy as jnp
import numpy as np
from jax.experimental import pallas as pl
from jax.experimental.pallas import tpu as pltpu


def _stable_softplus(x, beta):
    # softplus_beta(v) = log1p(exp(beta*v)) / beta, without exp overflow.
    z = beta * x
    return (jnp.maximum(z, 0.0) + jnp.log1p(jnp.exp(-jnp.abs(z)))) / beta


def make_passage_kernel(beta: float, pad_token_id: int, hidden_size: int):
    scale = 1.0 / (float(hidden_size) ** 0.5)

    def passage_kernel(ids_ref, cls_ref, emb_ref, wqT_ref, bq_ref, wk_ref,
                       wvT_ref, bv_ref, second_ref, third_ref, scal_ref):
        emb = emb_ref[...]                   # (Bt, S, H) matmul dtype (bf16 or f32)
        cls = cls_ref[...]                   # (Bt, H) f32
        cdt = emb.dtype

        # ---- Q projection on the MXU: (Bt,H)@(H,H), f32 accumulation ----
        q = jnp.dot(cls.astype(cdt), wqT_ref[...],
                    preferred_element_type=jnp.float32) + bq_ref[...]        # (Bt, H)

        # ---- Folded K projection: q.(emb Wk^T) == (q Wk).emb ----
        # (the q.bk term is a per-row constant across s, so it cancels in the softmax)
        qk = jnp.dot(q.astype(cdt), wk_ref[...],
                     preferred_element_type=jnp.float32)                     # (Bt, H)
        qk3 = qk.astype(cdt)[:, None, :]                                     # (Bt, 1, H)
        logits = jnp.einsum('bqh,bsh->bqs', qk3, emb,
                            preferred_element_type=jnp.float32) * scale      # (Bt, 1, S)

        # ---- masked softmax over the sequence (f32, lane-axis reductions) ----
        valid = ids_ref[...] != pad_token_id                                 # (Bt, 1, S)
        logits = jnp.where(valid, logits, -1e30)
        logits = logits - jnp.max(logits, axis=-1, keepdims=True)
        e = jnp.exp(logits)
        att = e / jnp.sum(e, axis=-1, keepdims=True)                         # (Bt, 1, S)

        # ---- Folded V projection: var = (att @ emb) @ Wv^T + bv ----
        ae3 = jnp.einsum('bqs,bsh->bqh', att.astype(cdt), emb,
                         preferred_element_type=jnp.float32)                 # (Bt, 1, H)
        ae = ae3[:, 0, :]                                                    # (Bt, H)
        var = jnp.dot(ae.astype(cdt), wvT_ref[...],
                      preferred_element_type=jnp.float32) + bv_ref[...]      # (Bt, H)

        # ---- softplus_beta applied only where var < 10 (overflow-safe form) ----
        soft = _stable_softplus(var, beta)
        var = jnp.where(var < 10.0, soft, var)

        # ---- final p_embedding pieces (exact reciprocal: user-visible outputs) ----
        inv_var = 1.0 / var
        second_ref[...] = -0.5 * inv_var                                     # (Bt, H)
        third_ref[...] = cls * inv_var                                       # (Bt, H)
        first = -0.5 * jnp.sum(jnp.log(var), axis=-1, keepdims=True)         # (Bt, 1)
        fourth = -0.5 * jnp.sum(cls * cls * inv_var, axis=-1, keepdims=True)  # (Bt, 1)
        # Lane-dense scalar slab: lane 0 = first, lane 1 = fourth, rest zero.
        lane = jax.lax.broadcasted_iota(jnp.int32, scal_ref.shape, 1)
        scal_ref[...] = jnp.where(lane == 0, first,
                                  jnp.where(lane == 1, fourth, 0.0))

    return passage_kernel


def _pick_bt(batch: int, target: int = 8):
    """Rows per grid step and padded batch size.

    Second-to-last dims of the 2-D blocks (cls/second/third/scal) must be a multiple of 8
    or equal the full array dim, so either Bt == B (small batches) or Bt is a multiple of
    8 and B is padded up to a multiple of Bt.
    """
    if batch <= target:
        return batch, batch
    bt = max(8, (target // 8) * 8)
    bpad = ((batch + bt - 1) // bt) * bt
    return bt, bpad


def _vmem_limit_bytes(bt, s, h, emb_bytes):
    est = (2 * bt * s * h * emb_bytes      # double-buffered streaming embedding block
           + 2 * bt * s * 4                # ids block
           + 2 * bt * h * 4                # cls block
           + 2 * 3 * h * h * emb_bytes     # resident weights (conservative 2x residency)
           + 4 * h * 4                     # biases
           + 2 * bt * (2 * h + 128) * 4    # double-buffered outputs
           + 8 * bt * max(s, h) * 4)       # f32 working-set headroom (q/att/var temps)
    try:
        cap = int(pltpu.get_tpu_info().vmem_capacity_bytes)   # 128 MiB v5e/v6e, 64 MiB v7x
    except Exception:
        cap = 128 * 1024 * 1024
    return int(min(max(2 * est, 32 * 1024 * 1024), (3 * cap) // 4))


def passage_model_forward(embedding, input_ids, params, *, pad_token_id=0, beta=1.0,
                          matmul_dtype=jnp.bfloat16, rows_per_step=8):
    """Build specs and call the Pallas kernel.

    embedding: (B, S, H) f32, input_ids: (B, S) int, params = (wq, bq, wk, bk, wv, bv)
    with PyTorch nn.Linear weight convention (out_features, in_features).
    """
    B, S, H = embedding.shape
    wq, bq, wk, bk, wv, bv = params
    # bk is never needed: q.bk is a per-row constant -> cancels in the softmax.
    del bk

    Bt, Bpad = _pick_bt(B, rows_per_step)
    ebytes = jnp.dtype(matmul_dtype).itemsize

    # CLS row kept separately in f32 so third/fourth stay full precision even when the
    # streamed embedding is bf16 (tiny extra HBM read of B*H*4 bytes).
    cls = embedding[:, 0, :].astype(jnp.float32)            # (B, H)
    emb_c = embedding.astype(matmul_dtype)                  # (B, S, H)
    ids3 = input_ids.astype(jnp.int32).reshape(B, 1, S)     # (B, 1, S)

    if Bpad != B:
        pad = Bpad - B
        emb_c = jnp.pad(emb_c, ((0, pad), (0, 0), (0, 0)))
        cls = jnp.pad(cls, ((0, pad), (0, 0)))
        ids3 = jnp.pad(ids3, ((0, pad), (0, 0), (0, 0)), constant_values=pad_token_id)

    # Pre-transpose Q/V in XLA so the kernel never transposes (no XLU work); Wk stays in
    # the original (out, in) layout because the folded-K path needs q @ Wk directly.
    wqT = wq.T.astype(matmul_dtype)
    wkc = wk.astype(matmul_dtype)
    wvT = wv.T.astype(matmul_dtype)
    bq_ = jnp.reshape(bq, (1, H)).astype(jnp.float32)
    bv_ = jnp.reshape(bv, (1, H)).astype(jnp.float32)

    # FLOPs after the K/V folds: three (Bt,H)@(H,H) projections + two S*H contractions.
    flops = int(Bpad * (6 * H * H + 4 * S * H + 16 * H + 6 * S))
    transcendentals = int(Bpad * (S + 3 * H))
    bytes_accessed = int(Bpad * S * H * ebytes + Bpad * S * 4 + Bpad * H * 4
                         + 3 * H * H * ebytes + 2 * H * 4
                         + Bpad * (2 * H + 128) * 4)

    second, third, scal = pl.pallas_call(
        make_passage_kernel(float(beta), int(pad_token_id), H),
        grid=(Bpad // Bt,),
        in_specs=[
            pl.BlockSpec((Bt, 1, S), lambda b: (b, 0, 0)),   # input_ids
            pl.BlockSpec((Bt, H), lambda b: (b, 0)),         # cls (f32)
            pl.BlockSpec((Bt, S, H), lambda b: (b, 0, 0)),   # embedding (HBM-streamed)
            # Constant index maps: blocks fetched once, no per-step re-DMA.
            pl.BlockSpec((H, H), lambda b: (0, 0)),          # Wq^T
            pl.BlockSpec((1, H), lambda b: (0, 0)),          # bq
            pl.BlockSpec((H, H), lambda b: (0, 0)),          # Wk (untransposed)
            pl.BlockSpec((H, H), lambda b: (0, 0)),          # Wv^T
            pl.BlockSpec((1, H), lambda b: (0, 0)),          # bv
        ],
        out_specs=(
            pl.BlockSpec((Bt, H), lambda b: (b, 0)),         # second
            pl.BlockSpec((Bt, H), lambda b: (b, 0)),         # third
            pl.BlockSpec((Bt, 128), lambda b: (b, 0)),       # [first, fourth, 0...]
        ),
        out_shape=(
            jax.ShapeDtypeStruct((Bpad, H), jnp.float32),
            jax.ShapeDtypeStruct((Bpad, H), jnp.float32),
            jax.ShapeDtypeStruct((Bpad, 128), jnp.float32),
        ),
        compiler_params=pltpu.CompilerParams(
            dimension_semantics=("parallel",),
            vmem_limit_bytes=_vmem_limit_bytes(Bt, S, H, ebytes)),
        cost_estimate=pl.CostEstimate(flops=flops,
                                      transcendentals=transcendentals,
                                      bytes_accessed=bytes_accessed),
    )(ids3, cls, emb_c, wqT, bq_, wkc, wvT, bv_)

    # Cheap wrapper-side layout plumbing to the module's (B, 2H+2) output.
    first = scal[:B, 0:1]
    fourth = scal[:B, 1:2]
    p_emb = jnp.concatenate([first, second[:B], third[:B], fourth], axis=-1)
    return {"p_embedding": p_emb}


def reference_forward(embedding, input_ids, params, *, pad_token_id=0, beta=1.0):
    """Pure-JAX reference mirroring the PyTorch forward (un-folded K/V, float32)."""
    wq, bq, wk, bk, wv, bv = params
    H = embedding.shape[-1]
    maskf = input_ids != pad_token_id
    cls = embedding[:, 0]
    q = cls @ wq.T + bq
    k = embedding @ wk.T + bk
    v = embedding @ wv.T + bv
    att = jnp.einsum("bh,bsh->bs", q, k) / (H ** 0.5)
    att = jnp.where(maskf, att, -1e30)
    att = jax.nn.softmax(att, axis=-1)
    var = jnp.einsum("bs,bsh->bh", att, v)
    soft = _stable_softplus(var, beta)
    var = jnp.where(var < 10.0, soft, var)
    first = -0.5 * jnp.sum(jnp.log(var), axis=-1, keepdims=True)
    second = -0.5 / var
    third = cls / var
    fourth = -0.5 * jnp.sum(cls * cls / var, axis=-1, keepdims=True)
    return jnp.concatenate([first, second, third, fourth], axis=-1)


if __name__ == "__main__":
    B, S, H = 2, 8, 32
    pad_token_id = 0
    beta = 1.0

    key = jax.random.PRNGKey(0)
    k_emb, k_ids, kq, kk, kv, kbq, kbk, kbv = jax.random.split(key, 8)

    # Synthetic "last_hidden_state" and token ids (last two positions are padding).
    embedding = jax.random.normal(k_emb, (B, S, H), dtype=jnp.float32)
    input_ids = jax.random.randint(k_ids, (B, S), 1, 100, dtype=jnp.int32)
    input_ids = input_ids.at[:, -2:].set(pad_token_id)

    # Deterministic parameter init: xavier-normal weights, small uniform biases.
    xav_std = (2.0 / (H + H)) ** 0.5
    wq = xav_std * jax.random.normal(kq, (H, H), dtype=jnp.float32)
    wk = xav_std * jax.random.normal(kk, (H, H), dtype=jnp.float32)
    wv = xav_std * jax.random.normal(kv, (H, H), dtype=jnp.float32)
    bnd = 1.0 / (H ** 0.5)
    bq = jax.random.uniform(kbq, (H,), jnp.float32, -bnd, bnd)
    bk = jax.random.uniform(kbk, (H,), jnp.float32, -bnd, bnd)
    bv = jax.random.uniform(kbv, (H,), jnp.float32, -bnd, bnd)
    params = (wq, bq, wk, bk, wv, bv)

    ref = reference_forward(embedding, input_ids, params,
                            pad_token_id=pad_token_id, beta=beta)

    # f32 matmul path: tight check of the folded-K/V algebra against the f32 reference.
    out32 = passage_model_forward(embedding, input_ids, params,
                                  pad_token_id=pad_token_id, beta=beta,
                                  matmul_dtype=jnp.float32)
    p32 = jax.block_until_ready(out32["p_embedding"])
    np.testing.assert_allclose(np.asarray(p32), np.asarray(ref), rtol=1e-3, atol=1e-3)

    # bf16-streamed path (default, HBM-roofline): loose tolerance for bf16 operands.
    out16 = passage_model_forward(embedding, input_ids, params,
                                  pad_token_id=pad_token_id, beta=beta)
    p16 = jax.block_until_ready(out16["p_embedding"])
    np.testing.assert_allclose(np.asarray(p16), np.asarray(ref), rtol=8e-2, atol=8e-2)

    assert p32.shape == (B, 2 * H + 2) and p16.shape == (B, 2 * H + 2)
    print("KERNEL_OK")
</pallas_src>

<mosaic_0001>
module attributes {stable_mosaic.version = 11 : i64} {
  func.func @passage_kernel(%arg0: i32, %arg1: memref<2x1x8xi32, #tpu.memory_space<vmem>>, %arg2: memref<2x32xf32, #tpu.memory_space<vmem>>, %arg3: memref<2x8x32xf32, #tpu.memory_space<vmem>>, %arg4: memref<32x32xf32, #tpu.memory_space<vmem>>, %arg5: memref<1x32xf32, #tpu.memory_space<vmem>>, %arg6: memref<32x32xf32, #tpu.memory_space<vmem>>, %arg7: memref<32x32xf32, #tpu.memory_space<vmem>>, %arg8: memref<1x32xf32, #tpu.memory_space<vmem>>, %arg9: memref<2x32xf32, #tpu.memory_space<vmem>>, %arg10: memref<2x32xf32, #tpu.memory_space<vmem>>, %arg11: memref<2x128xf32, #tpu.memory_space<vmem>>) attributes {dimension_semantics = [#tpu.dimension_semantics<parallel>], iteration_bounds = array<i64: 1>, scalar_prefetch = 0 : i64, scratch_operands = 0 : i64, tpu.core_type = #tpu.core_type<tc>, window_params = [{transform_indices = @transform_0, window_bounds = array<i64: 2, 1, 8>}, {transform_indices = @transform_1, window_bounds = array<i64: 2, 32>}, {transform_indices = @transform_2, window_bounds = array<i64: 2, 8, 32>}, {pipeline_mode = #tpu.pipeline_mode<synchronous>, transform_indices = @transform_3, window_bounds = array<i64: 32, 32>}, {pipeline_mode = #tpu.pipeline_mode<synchronous>, transform_indices = @transform_4, window_bounds = array<i64: 1, 32>}, {pipeline_mode = #tpu.pipeline_mode<synchronous>, transform_indices = @transform_5, window_bounds = array<i64: 32, 32>}, {pipeline_mode = #tpu.pipeline_mode<synchronous>, transform_indices = @transform_6, window_bounds = array<i64: 32, 32>}, {pipeline_mode = #tpu.pipeline_mode<synchronous>, transform_indices = @transform_7, window_bounds = array<i64: 1, 32>}, {transform_indices = @transform_8, window_bounds = array<i64: 2, 32>}, {transform_indices = @transform_9, window_bounds = array<i64: 2, 32>}, {transform_indices = @transform_10, window_bounds = array<i64: 2, 128>}]} {
    %c0 = arith.constant 0 : index
    %c0_0 = arith.constant 0 : index
    %c0_1 = arith.constant 0 : index
    %0 = vector.load %arg3[%c0, %c0_0, %c0_1] : memref<2x8x32xf32, #tpu.memory_space<vmem>>, vector<2x8x32xf32>
    %c0_2 = arith.constant 0 : index
    %c0_3 = arith.constant 0 : index
    %1 = vector.load %arg2[%c0_2, %c0_3] : memref<2x32xf32, #tpu.memory_space<vmem>>, vector<2x32xf32>
    %c0_4 = arith.constant 0 : index
    %c0_5 = arith.constant 0 : index
    %2 = vector.load %arg4[%c0_4, %c0_5] : memref<32x32xf32, #tpu.memory_space<vmem>>, vector<32x32xf32>
    %cst = arith.constant dense<0.000000e+00> : vector<2x32xf32>
    %3 = tpu.matmul %1, %2, %cst {dimension_numbers = #tpu.dot_dimension_numbers<[1], [0], [0], [1], [0, 0, 1, 1], [], []>} : vector<2x32xf32>, vector<32x32xf32>, vector<2x32xf32> -> vector<2x32xf32>
    %c0_6 = arith.constant 0 : index
    %c0_7 = arith.constant 0 : index
    %4 = vector.load %arg5[%c0_6, %c0_7] : memref<1x32xf32, #tpu.memory_space<vmem>>, vector<1x32xf32>
    %5 = vector.broadcast %4 : vector<1x32xf32> to vector<2x32xf32>
    %6 = arith.addf %3, %5 : vector<2x32xf32>
    %c0_8 = arith.constant 0 : index
    %c0_9 = arith.constant 0 : index
    %7 = vector.load %arg6[%c0_8, %c0_9] : memref<32x32xf32, #tpu.memory_space<vmem>>, vector<32x32xf32>
    %cst_10 = arith.constant dense<0.000000e+00> : vector<2x32xf32>
    %8 = tpu.matmul %6, %7, %cst_10 {dimension_numbers = #tpu.dot_dimension_numbers<[1], [0], [0], [1], [0, 0, 1, 1], [], []>} : vector<2x32xf32>, vector<32x32xf32>, vector<2x32xf32> -> vector<2x32xf32>
    %9 = vector.shape_cast %8 : vector<2x32xf32> to vector<2x1x32xf32>
    "tpu.trace_start"() <{level = 10 : i32, message = "bqh,bsh->bqs"}> : () -> ()
    %cst_11 = arith.constant dense<0.000000e+00> : vector<2x1x8xf32>
    %10 = tpu.matmul %9, %0, %cst_11 {dimension_numbers = #tpu.dot_dimension_numbers<[2], [2], [1], [1], [0, 0, 0, 1, 1, 1], [0], [0]>} : vector<2x1x32xf32>, vector<2x8x32xf32>, vector<2x1x8xf32> -> vector<2x1x8xf32>
    "tpu.trace_stop"() : () -> ()
    %cst_12 = arith.constant 0.176776692 : f32
    %11 = vector.broadcast %cst_12 : f32 to vector<2x1x8xf32>
    %12 = arith.mulf %10, %11 : vector<2x1x8xf32>
    %c0_13 = arith.constant 0 : index
    %c0_14 = arith.constant 0 : index
    %c0_15 = arith.constant 0 : index
    %13 = vector.load %arg1[%c0_13, %c0_14, %c0_15] : memref<2x1x8xi32, #tpu.memory_space<vmem>>, vector<2x1x8xi32>
    %c0_i32 = arith.constant 0 : i32
    %14 = vector.broadcast %c0_i32 : i32 to vector<2x1x8xi32>
    %15 = arith.cmpi ne, %13, %14 : vector<2x1x8xi32>
    %cst_16 = arith.constant -1.000000e+30 : f32
    %16 = vector.broadcast %cst_16 : f32 to vector<2x1x8xf32>
    %17 = arith.select %15, %12, %16 : vector<2x1x8xi1>, vector<2x1x8xf32>
    %cst_17 = arith.constant dense<0xFF800000> : vector<2x1xf32>
    %18 = vector.multi_reduction <maximumf>, %17, %cst_17 [2] : vector<2x1x8xf32> to vector<2x1xf32>
    %19 = vector.shape_cast %18 : vector<2x1xf32> to vector<2x1x1xf32>
    %20 = vector.broadcast %19 : vector<2x1x1xf32> to vector<2x1x8xf32>
    %21 = arith.subf %17, %20 : vector<2x1x8xf32>
    %22 = math.exp %21 : vector<2x1x8xf32>
    %cst_18 = arith.constant dense<0.000000e+00> : vector<2x1xf32>
    %23 = vector.multi_reduction <add>, %22, %cst_18 [2] : vector<2x1x8xf32> to vector<2x1xf32>
    %24 = vector.shape_cast %23 : vector<2x1xf32> to vector<2x1x1xf32>
    %25 = vector.broadcast %24 : vector<2x1x1xf32> to vector<2x1x8xf32>
    %26 = arith.divf %22, %25 : vector<2x1x8xf32>
    "tpu.trace_start"() <{level = 10 : i32, message = "bqs,bsh->bqh"}> : () -> ()
    %cst_19 = arith.constant dense<0.000000e+00> : vector<2x1x32xf32>
    %27 = tpu.matmul %26, %0, %cst_19 {dimension_numbers = #tpu.dot_dimension_numbers<[2], [1], [1], [2], [0, 0, 0, 1, 1, 2], [0], [0]>} : vector<2x1x8xf32>, vector<2x8x32xf32>, vector<2x1x32xf32> -> vector<2x1x32xf32>
    "tpu.trace_stop"() : () -> ()
    %28 = vector.shape_cast %27 : vector<2x1x32xf32> to vector<2x32xf32>
    %c0_20 = arith.constant 0 : index
    %c0_21 = arith.constant 0 : index
    %29 = vector.load %arg7[%c0_20, %c0_21] : memref<32x32xf32, #tpu.memory_space<vmem>>, vector<32x32xf32>
    %cst_22 = arith.constant dense<0.000000e+00> : vector<2x32xf32>
    %30 = tpu.matmul %28, %29, %cst_22 {dimension_numbers = #tpu.dot_dimension_numbers<[1], [0], [0], [1], [0, 0, 1, 1], [], []>} : vector<2x32xf32>, vector<32x32xf32>, vector<2x32xf32> -> vector<2x32xf32>
    %c0_23 = arith.constant 0 : index
    %c0_24 = arith.constant 0 : index
    %31 = vector.load %arg8[%c0_23, %c0_24] : memref<1x32xf32, #tpu.memory_space<vmem>>, vector<1x32xf32>
    %32 = vector.broadcast %31 : vector<1x32xf32> to vector<2x32xf32>
    %33 = arith.addf %30, %32 : vector<2x32xf32>
    %cst_25 = arith.constant 1.000000e+00 : f32
    %34 = vector.broadcast %cst_25 : f32 to vector<2x32xf32>
    %35 = arith.mulf %34, %33 : vector<2x32xf32>
    %cst_26 = arith.constant 0.000000e+00 : f32
    %36 = vector.broadcast %cst_26 : f32 to vector<2x32xf32>
    %37 = arith.maximumf %35, %36 : vector<2x32xf32>
    %38 = math.absf %35 : vector<2x32xf32>
    %cst_27 = arith.constant 0.000000e+00 : f32
    %39 = vector.broadcast %cst_27 : f32 to vector<2x32xf32>
    %40 = arith.subf %39, %38 : vector<2x32xf32>
    %41 = math.exp %40 : vector<2x32xf32>
    %42 = math.log1p %41 : vector<2x32xf32>
    %43 = arith.addf %37, %42 : vector<2x32xf32>
    %cst_28 = arith.constant 1.000000e+00 : f32
    %44 = vector.broadcast %cst_28 : f32 to vector<2x32xf32>
    %45 = arith.divf %43, %44 : vector<2x32xf32>
    %cst_29 = arith.constant 1.000000e+01 : f32
    %46 = vector.broadcast %cst_29 : f32 to vector<2x32xf32>
    %47 = arith.cmpf olt, %33, %46 : vector<2x32xf32>
    %48 = arith.select %47, %45, %33 : vector<2x32xi1>, vector<2x32xf32>
    %cst_30 = arith.constant 1.000000e+00 : f32
    %49 = vector.broadcast %cst_30 : f32 to vector<2x32xf32>
    %50 = arith.divf %49, %48 : vector<2x32xf32>
    %cst_31 = arith.constant -5.000000e-01 : f32
    %51 = vector.broadcast %cst_31 : f32 to vector<2x32xf32>
    %52 = arith.mulf %51, %50 : vector<2x32xf32>
    %c0_32 = arith.constant 0 : index
    %c0_33 = arith.constant 0 : index
    %53 = vector.load %arg9[%c0_32, %c0_33] : memref<2x32xf32, #tpu.memory_space<vmem>>, vector<2x32xf32>
    tpu.vector_store %arg9[%c0_32, %c0_33], %52 {strides = array<i32>} : memref<2x32xf32, #tpu.memory_space<vmem>>, vector<2x32xf32>,
    %54 = arith.mulf %1, %50 : vector<2x32xf32>
    %c0_34 = arith.constant 0 : index
    %c0_35 = arith.constant 0 : index
    %55 = vector.load %arg10[%c0_34, %c0_35] : memref<2x32xf32, #tpu.memory_space<vmem>>, vector<2x32xf32>
    tpu.vector_store %arg10[%c0_34, %c0_35], %54 {strides = array<i32>} : memref<2x32xf32, #tpu.memory_space<vmem>>, vector<2x32xf32>,
    %56 = math.log %48 : vector<2x32xf32>
    %cst_36 = arith.constant dense<0.000000e+00> : vector<2xf32>
    %57 = vector.multi_reduction <add>, %56, %cst_36 [1] : vector<2x32xf32> to vector<2xf32>
    %58 = vector.shape_cast %57 : vector<2xf32> to vector<2x1xf32>
    %cst_37 = arith.constant -5.000000e-01 : f32
    %59 = vector.broadcast %cst_37 : f32 to vector<2x1xf32>
    %60 = arith.mulf %59, %58 : vector<2x1xf32>
    %61 = arith.mulf %1, %1 : vector<2x32xf32>
    %62 = arith.mulf %61, %50 : vector<2x32xf32>
    %cst_38 = arith.constant dense<0.000000e+00> : vector<2xf32>
    %63 = vector.multi_reduction <add>, %62, %cst_38 [1] : vector<2x32xf32> to vector<2xf32>
    %64 = vector.shape_cast %63 : vector<2xf32> to vector<2x1xf32>
    %cst_39 = arith.constant -5.000000e-01 : f32
    %65 = vector.broadcast %cst_39 : f32 to vector<2x1xf32>
    %66 = arith.mulf %65, %64 : vector<2x1xf32>
    %67 = tpu.iota {dimensions = array<i32: 1>} : vector<2x128xi32>
    %c0_i32_40 = arith.constant 0 : i32
    %68 = vector.broadcast %c0_i32_40 : i32 to vector<2x128xi32>
    %69 = arith.cmpi eq, %67, %68 : vector<2x128xi32>
    %c1_i32 = arith.constant 1 : i32
    %70 = vector.broadcast %c1_i32 : i32 to vector<2x128xi32>
    %71 = arith.cmpi eq, %67, %70 : vector<2x128xi32>
    %cst_41 = arith.constant 0.000000e+00 : f32
    %72 = vector.shape_cast %66 : vector<2x1xf32> to vector<2x1xf32>
    %73 = vector.broadcast %72 : vector<2x1xf32> to vector<2x128xf32>
    %74 = vector.broadcast %cst_41 : f32 to vector<2x128xf32>
    %75 = arith.select %71, %73, %74 : vector<2x128xi1>, vector<2x128xf32>
    %76 = vector.shape_cast %60 : vector<2x1xf32> to vector<2x1xf32>
    %77 = vector.broadcast %76 : vector<2x1xf32> to vector<2x128xf32>
    %78 = arith.select %69, %77, %75 : vector<2x128xi1>, vector<2x128xf32>
    %c0_42 = arith.constant 0 : index
    %c0_43 = arith.constant 0 : index
    %79 = vector.load %arg11[%c0_42, %c0_43] : memref<2x128xf32, #tpu.memory_space<vmem>>, vector<2x128xf32>
    tpu.vector_store %arg11[%c0_42, %c0_43], %78 {strides = array<i32>} : memref<2x128xf32, #tpu.memory_space<vmem>>, vector<2x128xf32>,
    return
  }
  func.func @transform_0(%arg0: i32) -> (i32, i32, i32) {
    %c0_i32 = arith.constant 0 : i32
    %c0_i32_0 = arith.constant 0 : i32
    %c0_i32_1 = arith.constant 0 : i32
    return %arg0, %c0_i32, %c0_i32_0 : i32, i32, i32
  }
  func.func @transform_1(%arg0: i32) -> (i32, i32) {
    %c0_i32 = arith.constant 0 : i32
    %c0_i32_0 = arith.constant 0 : i32
    return %arg0, %c0_i32 : i32, i32
  }
  func.func @transform_2(%arg0: i32) -> (i32, i32, i32) {
    %c0_i32 = arith.constant 0 : i32
    %c0_i32_0 = arith.constant 0 : i32
    %c0_i32_1 = arith.constant 0 : i32
    return %arg0, %c0_i32, %c0_i32_0 : i32, i32, i32
  }
  func.func @transform_3(%arg0: i32) -> (i32, i32) {
    %c0_i32 = arith.constant 0 : i32
    %c0_i32_0 = arith.constant 0 : i32
    %c0_i32_1 = arith.constant 0 : i32
    return %c0_i32, %c0_i32_0 : i32, i32
  }
  func.func @transform_4(%arg0: i32) -> (i32, i32) {
    %c0_i32 = arith.constant 0 : i32
    %c0_i32_0 = arith.constant 0 : i32
    %c0_i32_1 = arith.constant 0 : i32
    return %c0_i32, %c0_i32_0 : i32, i32
  }
  func.func @transform_5(%arg0: i32) -> (i32, i32) {
    %c0_i32 = arith.constant 0 : i32
    %c0_i32_0 = arith.constant 0 : i32
    %c0_i32_1 = arith.constant 0 : i32
    return %c0_i32, %c0_i32_0 : i32, i32
  }
  func.func @transform_6(%arg0: i32) -> (i32, i32) {
    %c0_i32 = arith.constant 0 : i32
    %c0_i32_0 = arith.constant 0 : i32
    %c0_i32_1 = arith.constant 0 : i32
    return %c0_i32, %c0_i32_0 : i32, i32
  }
  func.func @transform_7(%arg0: i32) -> (i32, i32) {
    %c0_i32 = arith.constant 0 : i32
    %c0_i32_0 = arith.constant 0 : i32
    %c0_i32_1 = arith.constant 0 : i32
    return %c0_i32, %c0_i32_0 : i32, i32
  }
  func.func @transform_8(%arg0: i32) -> (i32, i32) {
    %c0_i32 = arith.constant 0 : i32
    %c0_i32_0 = arith.constant 0 : i32
    return %arg0, %c0_i32 : i32, i32
  }
  func.func @transform_9(%arg0: i32) -> (i32, i32) {
    %c0_i32 = arith.constant 0 : i32
    %c0_i32_0 = arith.constant 0 : i32
    return %arg0, %c0_i32 : i32, i32
  }
  func.func @transform_10(%arg0: i32) -> (i32, i32) {
    %c0_i32 = arith.constant 0 : i32
    %c0_i32_0 = arith.constant 0 : i32
    return %arg0, %c0_i32 : i32, i32
  }
}

</mosaic_0001>

<bundles_post_ra>
// kernel: tpu_custom_call.1
= control target key start
LH: loop header
LB: loop body
LE: loop exit
PB: predicated region body
PF: predicated region fallthrough
CT: control target
= control target key end

     0   :  { %16 = vsyncpa [#allocation3], 0  ;;  %s1282_s0 = inlined_call_operand.hbm [shape: s32[2,1,8], index: 0, kind: input, shape index: {}]   ;;  %s1283_s1 = inlined_call_operand.hbm [shape: f32[2,32], index: 1, kind: input, shape index: {}]   ;;  %s1284_s2 = inlined_call_operand.hbm [shape: f32[2,8,32], index: 2, kind: input, shape index: {}]   ;;  %s1285_s3 = inlined_call_operand.hbm [shape: f32[32,32], index: 3, kind: input, shape index: {}]   ;;  %s1286_s4 = inlined_call_operand.vmem [shape: f32[1,32], index: 4, kind: input, shape index: {}]   ;;  %s1287_s5 = inlined_call_operand.hbm [shape: f32[32,32], index: 5, kind: input, shape index: {}]   ;;  %s1288_s6 = inlined_call_operand.hbm [shape: f32[32,32], index: 6, kind: input, shape index: {}]   ;;  %s1289_s7 = inlined_call_operand.vmem [shape: f32[1,32], index: 7, kind: input, shape index: {}]   ;;  %s1290_s8 = inlined_call_operand.hbm [shape: f32[2,32], index: 8, kind: output, shape index: {0}]   ;;  %s1291_s9 = inlined_call_operand.hbm [shape: f32[2,32], index: 9, kind: output, shape index: {1}]   ;;  %s1292_s10 = inlined_call_operand.hbm [shape: f32[2,128], index: 10, kind: output, shape index: {2}]  }
   0x1   :  { %17 = vsyncpa [#allocation6], 0 }
   0x2   :  { %18 = vsyncpa [#allocation9], 0 }
   0x3   :  { %19 = vsyncpa [#allocation12], 0 }
   0x4   :  { %20 = vsyncpa [#allocation4], 0 }
   0x5   :  { %21 = vsyncpa [#allocation15], 0  ;;  %s1117_s13 = smov [#allocation5]  }
   0x6   :  { %s40_s14 = sshll.u32 %s1117_s13, 4  ;;  %s41_s14 = int_to_ptr.vmem [resolvable:$true] %s40_s14 }
   0x7   :  { %s933_s15 = scalar_lea.vmem %s41_s14, 32  ;;  %p938_p1 = scmp.lt.s32.totalorder %s41_s14, %s41_s14 }
   0x8   :  { %p934_p0 = scmp.ne.s32.totalorder %s41_s14, %s933_s15  ;;  %p939_p2 = scmp.lt.s32.totalorder %s933_s15, %s933_s15 }
   0xa   :  { %p940_p3 = por %p939_p2, %p938_p1 }
   0xc   :  { %p941_p4 = pnand %p940_p3, %p934_p0 }
   0xe   :  { %944 = shalt.err (!%p941_p4)
}
   0xf   :  { %43 = dma.hbm_to_vmem [thread:$0]  %s1283_s1, 32, %s41_s14, [#allocation6]  }
  0x10   :  { %s1118_s18 = smov [#allocation8]   ;;  %s1119_s20 = smov [#allocation2]  }
  0x11   :  { %s61_s19 = sshll.u32 %s1118_s18, 4  ;;  %s27_s21 = sshll.u32 %s1119_s20, 4  ;;  %s62_s19 = int_to_ptr.vmem [resolvable:$true] %s61_s19  ;;  %s28_s21 = int_to_ptr.vmem [resolvable:$true] %s27_s21 }
  0x12   :  { %s953_s22 = scalar_lea.vmem %s62_s19, 512  ;;  %p958_p6 = scmp.lt.s32.totalorder %s62_s19, %s62_s19 }
  0x13   :  { %p954_p5 = scmp.ne.s32.totalorder %s62_s19, %s953_s22  ;;  %p959_p7 = scmp.lt.s32.totalorder %s953_s22, %s953_s22 }
  0x15   :  { %p960_p8 = por %p959_p7, %p958_p6 }
  0x17   :  { %p961_p9 = pnand %p960_p8, %p954_p5 }
  0x19   :  { %964 = shalt.err (!%p961_p9)
}
  0x1a   :  { %s1120_s23 = smov 128   ;;  %s1121_s24 = smov 8  }
  0x1b   :  { %67 = dma.hbm_to_vmem [thread:$0]  %s1285_s3, 512, %s62_s19, [#allocation9], %s1120_s23, %s1120_s23, %s1121_s24  }
  0x1c   :  { %s973_s1 = scalar_lea.vmem %s28_s21, 32  ;;  %p978_p11 = scmp.lt.s32.totalorder %s28_s21, %s28_s21 }
  0x1d   :  { %p974_p10 = scmp.ne.s32.totalorder %s28_s21, %s973_s1  ;;  %p979_p12 = scmp.lt.s32.totalorder %s973_s1, %s973_s1 }
  0x1f   :  { %p980_p13 = por %p979_p12, %p978_p11 }
  0x21   :  { %p981_p0 = pnand %p980_p13, %p974_p10 }
  0x23   :  { %984 = shalt.err (!%p981_p0)
}
  0x24   :  { %s1122_s27 = smov 16   ;;  %s1123_s28 = smov 1  }
  0x25   :  { %33 = dma.hbm_to_vmem [thread:$0]  %s1282_s0, 32, %s28_s21, [#allocation3], %s1122_s27, %s1122_s27, %s1123_s28  }
  0x26   :  { %s1124_s11 = smov [#allocation7]   ;;  %s1125_s13 = smov [#allocation10]  }
  0x27   :  { %s49_s12 = sshll.u32 %s1124_s11, 4  ;;  %s75_s14 = sshll.u32 %s1125_s13, 4  ;;  %s50_s12 = int_to_ptr.vmem [resolvable:$true] %s49_s12  ;;  %s76_s14 = int_to_ptr.vmem [resolvable:$true] %s75_s14 }
  0x28   :  { %s993_s3 = scalar_lea.vmem %s50_s12, 256  ;;  %p998_p2 = scmp.lt.s32.totalorder %s50_s12, %s50_s12 }
  0x29   :  { %p994_p1 = scmp.ne.s32.totalorder %s50_s12, %s993_s3  ;;  %p999_p3 = scmp.lt.s32.totalorder %s993_s3, %s993_s3 }
  0x2b   :  { %p1000_p4 = por %p999_p3, %p998_p2 }
  0x2d   :  { %p1001_p5 = pnand %p1000_p4, %p994_p1 }
  0x2f   :  { %1004 = shalt.err (!%p1001_p5)
}
  0x30   :  { %55 = dma.hbm_to_vmem [thread:$0]  %s1284_s2, 256, %s50_s12, [#allocation6], %s1120_s23, %s1120_s23, %s1121_s24  }
  0x31   :  { %s1013_s0 = scalar_lea.vmem %s76_s14, 512  ;;  %p1018_p7 = scmp.lt.s32.totalorder %s76_s14, %s76_s14 }
  0x32   :  { %p1014_p6 = scmp.ne.s32.totalorder %s76_s14, %s1013_s0  ;;  %p1019_p8 = scmp.lt.s32.totalorder %s1013_s0, %s1013_s0 }
  0x34   :  { %p1020_p9 = por %p1019_p8, %p1018_p7 }
  0x36   :  { %p1021_p10 = pnand %p1020_p9, %p1014_p6 }
  0x38   :  { %1024 = shalt.err (!%p1021_p10)
}
  0x39   :  { %81 = dma.hbm_to_vmem [thread:$0]  %s1287_s5, 512, %s76_s14, [#allocation9], %s1120_s23, %s1120_s23, %s1121_s24  }
  0x3a   :  { %s1126_s19 = smov [#allocation11]  }
  0x3b   :  { %s87_s20 = sshll.u32 %s1126_s19, 4  ;;  %s88_s20 = int_to_ptr.vmem [resolvable:$true] %s87_s20 }
  0x3c   :  { %s1033_s21 = scalar_lea.vmem %s88_s20, 512  ;;  %p1038_p12 = scmp.lt.s32.totalorder %s88_s20, %s88_s20 }
  0x3d   :  { %p1034_p11 = scmp.ne.s32.totalorder %s88_s20, %s1033_s21  ;;  %p1039_p13 = scmp.lt.s32.totalorder %s1033_s21, %s1033_s21 }
  0x3f   :  { %p1040_p0 = por %p1039_p13, %p1038_p12 }
  0x41   :  { %p1041_p1 = pnand %p1040_p0, %p1034_p11 }
  0x43   :  { %1044 = shalt.err (!%p1041_p1)
}
  0x44   :  { %93 = dma.hbm_to_vmem [thread:$0]  %s1288_s6, 512, %s88_s20, [#allocation12], %s1120_s23, %s1120_s23, %s1121_s24  }
  0x45   :  { %1105 = dma.done.wait [#allocation3], 32  }
  0x46   :  { %1106 = vsyncadd [#allocation3], 4294967264 }
  0x47   :  { %1107 = dma.done.wait [#allocation6], 288  }
  0x48   :  { %1108 = vsyncadd [#allocation6], 4294967008 }
  0x49   :  { %1109 = dma.done.wait [#allocation9], 1024  }
  0x4a   :  { %1110 = vsyncadd [#allocation9], 4294966272 }
  0x4b   :  { %1111 = dma.done.wait [#allocation12], 512  }
  0x4c   :  { %1112 = vsyncadd [#allocation12], 4294966784  ;;  %v1127_v0 = vmov 0.0   ;;  %vm1128_vm0 = vmmov 0   ;;  %v120_v1 = vld [vmem:[#allocation8 + $0x18] sm:$0xff]  ;;  %v119_v2 = vld [vmem:[#allocation8 + $0x10] sm:$0xff]  ;;  %v283_v17 = vlaneseq }
  0x4d   :  { %840 = vmatprep.subr.mxu0 %v1127_v0  ;;  %848 = vmatprep.mubr.msk.f32.mxu0 %vm1128_vm0, %v1127_v0  ;;  %v205_v3 = vld [vmem:[#allocation10 + $0x18] sm:$0xff]  ;;  %v118_v4 = vld [vmem:[#allocation8 + $0x8] sm:$0xff]  ;;  %v204_v5 = vld [vmem:[#allocation10 + $0x10] sm:$0xff]  ;;  %vm128_vm1 = vcmask 261120   ;;  %v1129_v15 = vmov 1966171168  }
  0x4e   :  { %851 = vmatprep.subr.mxu1 %v1127_v0  ;;  %859 = vmatprep.mubr.msk.f32.mxu1 %vm1128_vm0, %v1127_v0  ;;  %v117_v6 = vld [vmem:[#allocation8] sm:$0xff]  ;;  %v1227_v7 = vld [vmem:[#allocation5] sm:$0x3]  ;;  %v806_v10 = vld [vmem:[%s1286_s4] ss:$0 sm:$0xff]  ;;  %v281_v16 = vunpack.c.l.s4 %v1129_v15  ;;  %v284_v19 = vshrl.u32 %v283_v17, 7 }
  0x4f   :  { %841 = vmatpush3.msra.mxu0 %v120_v1  ;;  %852 = vmatpush3.msra.mxu1 %v205_v3  ;;  %v203_v8 = vld [vmem:[#allocation10 + $0x8] sm:$0xff]  ;;  %v202_v9 = vld [vmem:[#allocation10] sm:$0xff]  ;;  %v114_v14 = vld [vmem:[#allocation7] sm:$0xff]  ;;  %vm460_vm4 = vcmask 57344   ;;  %vm483_vm5 = vcmask 64512   ;;  %vm644_vm6 = vcmask 1041409  }
  0x50   :  { %842 = vmatprep.subr.mxu0 %v1127_v0  ;;  %853 = vmatprep.subr.mxu1 %v1127_v0  ;;  %v282_v18 = vunpack.c.0.s8 %v281_v16  ;;  %v115_v26 = vld [vmem:[#allocation7 + $0x8] sm:$0xff]  ;;  %v455_v29 = vld [vmem:[#allocation2 + $0x1] sm:$0x1]  ;;  %v454_v31 = vld [vmem:[#allocation2] sm:$0x1]  ;;  %vm738_vm9 = vcmask 254976  }
  0x51   :  { %843 = vmatpush3.msra.mxu0 %v119_v2  ;;  %854 = vmatpush3.msra.mxu1 %v204_v5  ;;  %vm457_vm2 = vcmp.ne.s32.totalorder %v455_v29, 0  ;;  %vm456_vm3 = vcmp.ne.s32.totalorder %v454_v31, 0  ;;  %v633_v56 = vld [vmem:[#allocation11 + $0x18] sm:$0xff]  ;;  %v632_v57 = vld [vmem:[#allocation11 + $0x10] sm:$0xff]  ;;  %v631_v58 = vld [vmem:[#allocation11 + $0x8] sm:$0xff]  ;;  %s1131_s25 = smov [#allocation13]  }
  0x52   :  { %844 = vmatprep.subr.mxu0 %v1127_v0  ;;  %855 = vmatprep.subr.mxu1 %v1127_v0  ;;  %v285_v20 = vsub.s32 %v282_v18, %v284_v19  ;;  %v630_v59 = vld [vmem:[#allocation11] sm:$0xff]  ;;  %v815_v3 = vld [vmem:[%s1289_s7] ss:$0 sm:$0xff]  ;;  %s1130_s7 = smov [#allocation14]   ;;  %s767_s26 = sshll.u32 %s1131_s25, 4  ;;  %s768_s26 = int_to_ptr.vmem [resolvable:$true] %s767_s26 }
  0x53   :  { %845 = vmatpush3.msra.mxu0 %v118_v4  ;;  %856 = vmatpush3.msra.mxu1 %v203_v8  ;;  %s777_s24 = sshll.u32 %s1130_s7, 4  ;;  %s778_s24 = int_to_ptr.vmem [resolvable:$true] %s777_s24 }
  0x54   :  { %846 = vmatprep.subr.mxu0 %v1127_v0  ;;  %857 = vmatprep.subr.mxu1 %v1127_v0  ;;  %s1045_s1 = scalar_lea.vmem %s778_s24, 32  ;;  %p1050_p3 = scmp.lt.s32.totalorder %s778_s24, %s778_s24 }
  0x55   :  { %847 = vmatpush3.msra.mxu0 %v117_v6  ;;  %858 = vmatpush3.msra.mxu1 %v202_v9  ;;  %p1046_p2 = scmp.ne.s32.totalorder %s778_s24, %s1045_s1  ;;  %p1051_p4 = scmp.lt.s32.totalorder %s1045_s1, %s1045_s1 }
  0x56   :  { %849 = vmatmul.mubr.msk.f32.vlgmr.msra.gmra.mxu0 %vm128_vm1, %v1227_v7  ;;  %872 = vmatprep.subr.mxu0 %v1127_v0 }
  0x57   :  { %874 = vmatprep.mubr.msk.f32.mxu0 %vm1128_vm0, %v1127_v0  ;;  %862 = vmatprep.subr.mxu1 %v1127_v0  ;;  %p1052_p5 = por %p1051_p4, %p1050_p3 }
  0x58   :  { %873 = vmatpush3.msra.mxu0 %v114_v14 }
  0x59   :  { %882 = vmatprep.subr.mxu0 %v1127_v0  ;;  %p1053_p6 = pnand %p1052_p5, %p1046_p2 }
 0x116   :  { %v198_v11 = vpop.f32.mrf.mxu0 }
 0x117   :  { %v199_v12 = vadd.f32 %v806_v10, %v198_v11 }
 0x118   :  { %v850_v13 = vpop.f32.mrf.mxu0 }
 0x119   :  { %860 = vmatmul.mubr.msk.f32.vlgmr.msra.gmra.mxu1 %vm128_vm1, %v199_v12 }
 0x11a   :  { %864 = vmatprep.mubr.msk.f32.mxu1 %vm1128_vm0, %v1127_v0  ;;  %863 = vmatpush3.xpose.msk.msra.mxu1 %vm128_vm1, %v114_v14 }
 0x11b   :  { %867 = vmatprep.subr.mxu1 %v1127_v0 }
 0x1d9   :  { %v275_v21 = vpop.f32.mrf.mxu1 }
 0x1da   :  { %v286_v22 = vrot.slane %v275_v21, %v285_v20 }
 0x1db   :  { %v861_v23 = vpop.f32.mrf.mxu1 }
 0x1dc   :  { %v287_v24 = vcombine.high %v286_v22, %v286_v22  ;;  %v294_v25 = vrot.slane %v286_v22, %v285_v20  ;;  %v748_v23 = vmul.f32 %v1227_v7, %v1227_v7 }
 0x1de   :  { %865 = vmatmul.mubr.msk.f32.vlgmr.msra.gmra.mxu1 %vm128_vm1, %v294_v25  ;;  %v301_v27 = vrot.slane %v287_v24, %v285_v20 }
 0x1df   :  { %868 = vmatpush3.xpose.msk.msra.mxu1 %vm128_vm1, %v115_v26  ;;  %869 = vmatprep.mubr.msk.f32.mxu1 %vm1128_vm0, %v1127_v0 }
 0x1e0   :  { %877 = vmatprep.subr.mxu1 %v1127_v0 }
 0x1e2   :  { %870 = vmatmul.mubr.msk.f32.vlgmr.msra.gmra.mxu1 %vm128_vm1, %v301_v27 }
 0x1e3   :  { %878 = vmatpush3.msra.mxu1 %v115_v26  ;;  %879 = vmatprep.mubr.msk.f32.mxu1 %vm1128_vm0, %v1127_v0 }
 0x29e   :  { %v373_v28 = vpop.f32.mrf.mxu1 }
 0x29f   :  { %v452_v33 = vmul.f32 0.17677669, %v373_v28 }
 0x2a0   :  { %v866_v30 = vpop.f32.mrf.mxu1 }
 0x2a1   :  { %v458_v38 = vsel %vm456_vm3, %v452_v33, -1e+30 }
 0x2a2   :  { %v448_v32 = vpop.f32.mrf.mxu1  ;;  %v461_v39 = vsel %vm460_vm4, %v458_v38, -inf }
 0x2a3   :  { %v453_v34 = vmul.f32 0.17677669, %v448_v32 }
 0x2a4   :  { %v871_v35 = vpop.f32.mrf.mxu1 }
 0x2a5   :  { %v459_v36 = vsel %vm457_vm2, %v453_v34, -1e+30 }
 0x2a6   :  { %v464_v37 = vsel %vm460_vm4, %v459_v36, -inf }
 0x2a7   :  { %465 = vmax.xlane.f32.xlu0 %v464_v37 }
 0x2ab   :  { %462 = vmax.xlane.f32.xlu0 %v461_v39 }
 0x330   :  { %v466_v40 = vpop.xlane.xlu0 %465 }
 0x331   :  { %v468_v41 = vsub.f32 %v459_v36, %v466_v40 }
 0x333   :  { %v471_v42 = vmul.f32 1.442695, %v468_v41 }
 0x334   :  { %v463_v43 = vpop.xlane.xlu0 %462 }
 0x335   :  { %909 = vpow2.f32 %v471_v42  ;;  %v467_v44 = vsub.f32 %v458_v38, %v463_v43 }
 0x337   :  { %v469_v45 = vmul.f32 1.442695, %v467_v44 }
 0x339   :  { %911 = vpow2.f32 %v469_v45 }
 0x342   :  { %v910_v46 = vpop.eup %909 }
 0x343   :  { %v476_v47 = vsel %vm460_vm4, %v910_v46, 0.0 }
 0x344   :  { %477 = vadd.xlane.f32.xlu1 %v476_v47 }
 0x346   :  { %v912_v48 = vpop.eup %911 }
 0x347   :  { %v473_v49 = vsel %vm460_vm4, %v912_v48, 0.0 }
 0x348   :  { %474 = vadd.xlane.f32.xlu1 %v473_v49 }
 0x3cd   :  { %v478_v50 = vpop.xlane.xlu1 %477 }
 0x3ce   :  { %913 = vrcp.f32 %v478_v50 }
 0x3d1   :  { %v475_v51 = vpop.xlane.xlu1 %474 }
 0x3d2   :  { %915 = vrcp.f32 %v475_v51 }
 0x3db   :  { %v914_v52 = vpop.eup %913 }
 0x3dc   :  { %v482_v53 = vmul.f32 %v914_v52, %v910_v46 }
 0x3de   :  { %880 = vmatmul.mubr.msk.f32.vlgmr.msra.gmra.mxu1 %vm483_vm5, %v482_v53 }
 0x3df   :  { %v916_v54 = vpop.eup %915 }
 0x3e0   :  { %v480_v55 = vmul.f32 %v916_v54, %v912_v48 }
 0x3e2   :  { %875 = vmatmul.mubr.msk.f32.vlgmr.msra.gmra.mxu0 %vm483_vm5, %v480_v55 }
 0x3e3   :  { %883 = vmatpush3.msra.mxu0 %v633_v56  ;;  %890 = vmatprep.mubr.msk.f32.mxu0 %vm1128_vm0, %v1127_v0 }
 0x3e4   :  { %884 = vmatprep.subr.mxu0 %v1127_v0 }
 0x3e5   :  { %885 = vmatpush3.msra.mxu0 %v632_v57 }
 0x3e6   :  { %886 = vmatprep.subr.mxu0 %v1127_v0 }
 0x3e7   :  { %887 = vmatpush3.msra.mxu0 %v631_v58 }
 0x3e8   :  { %888 = vmatprep.subr.mxu0 %v1127_v0 }
 0x3e9   :  { %889 = vmatpush3.msra.mxu0 %v630_v59 }
 0x49e   :  { %v626_v60 = vpop.f32.mrf.mxu1 }
 0x49f   :  { %v643_v62 = vrot.slane %v626_v60, 7 }
 0x4a0   :  { %v881_v61 = vpop.f32.mrf.mxu1 }
 0x4a2   :  { %v553_v63 = vpop.f32.mrf.mxu0 }
 0x4a3   :  { %v645_v1 = vsel %vm644_vm6, %v643_v62, %v553_v63 }
 0x4a4   :  { %v876_v2 = vpop.f32.mrf.mxu0  ;;  %891 = vmatmul.mubr.msk.f32.vlgmr.msra.gmra.mxu0 %vm128_vm1, %v645_v1 }
 0x564   :  { %v714_v4 = vpop.f32.mrf.mxu0 }
 0x565   :  { %v715_v5 = vadd.f32 %v815_v3, %v714_v4 }
 0x566   :  { %v892_v6 = vpop.f32.mrf.mxu0 }
 0x567   :  { %v719_v8 = vand.u32 2147483647, %v715_v5  ;;  %v718_v19 = vmax.f32 %v715_v5, 0.0  ;;  %vm733_vm8 = vcmp.lt.f32.partialorder %v715_v5, 10.0 }
 0x569   :  { %v720_v0 = vsub.f32 0.0, %v719_v8 }
 0x56b   :  { %v721_v9 = vmul.f32 1.442695, %v720_v0 }
 0x56d   :  { %917 = vpow2.f32 %v721_v9 }
 0x57a   :  { %v918_v10 = vpop.eup %917 }
 0x57b   :  { %v723_v11 = vadd.f32 1.0, %v918_v10  ;;  %v726_v12 = vmul.f32 -0.5, %v918_v10  ;;  %v729_v14 = vand.u32 2147483647, %v918_v10 }
 0x57d   :  { %919 = vlog2.f32 %v723_v11  ;;  %v727_v13 = vadd.f32 1.0, %v726_v12  ;;  %vm730_vm7 = vcmp.lt.f32.partialorder %v729_v14, 0.0004427343 }
 0x57f   :  { %v728_v18 = vmul.f32 %v918_v10, %v727_v13 }
 0x58a   :  { %v920_v15 = vpop.eup %919 }
 0x58b   :  { %v725_v16 = vmul.f32 0.6931472, %v920_v15 }
 0x58d   :  { %v731_v20 = vsel %vm730_vm7, %v728_v18, %v725_v16 }
 0x58e   :  { %v732_v21 = vadd.f32 %v731_v20, %v718_v19 }
 0x590   :  { %v734_v22 = vsel %vm733_vm8, %v732_v21, %v715_v5 }
 0x591   :  { %921 = vlog2.f32 %v734_v22 }
 0x592   :  { %923 = vrcp.f32 %v734_v22 }
 0x59e   :  { %v922_v24 = vpop.eup %921 }
 0x59f   :  { %v924_v25 = vpop.eup %923  ;;  %v743_v26 = vmul.f32 0.6931472, %v922_v24 }
 0x5a0   :  { %v749_v27 = vmul.f32 %v924_v25, %v748_v23  ;;  %v740_v28 = vmul.f32 %v924_v25, %v1227_v7  ;;  %v737_v29 = vmul.f32 -0.5, %v924_v25 }
 0x5a1   :  { %v744_v30 = vsel %vm738_vm9, %v743_v26, 0.0 }
 0x5a2   :  { %745 = vadd.xlane.f32.xlu1 %v744_v30  ;;  %v750_v31 = vsel %vm738_vm9, %v749_v27, 0.0  ;;  %741 = vst.msk [vmem:[#allocation14] sm:$0x3] %vm738_vm9, %v740_v28  ;;  %739 = vst.msk [vmem:[#allocation13] sm:$0x3] %vm738_vm9, %v737_v29 }
 0x5a3   :  { %751 = vadd.xlane.f32.xlu0 %v750_v31 }
 0x5a4   :  { %1056 = shalt.err (!%p1053_p6)
}
 0x5a5   :  { %780 = dma.vmem_to_hbm [thread:$0]  %s778_s24, 32, %s1291_s9, [#allocation15]  }
 0x5a6   :  { %s1065_s29 = scalar_lea.vmem %s768_s26, 32  ;;  %p1070_p8 = scmp.lt.s32.totalorder %s768_s26, %s768_s26 }
 0x5a7   :  { %p1066_p7 = scmp.ne.s32.totalorder %s768_s26, %s1065_s29  ;;  %p1071_p9 = scmp.lt.s32.totalorder %s1065_s29, %s1065_s29 }
 0x5a9   :  { %p1072_p10 = por %p1071_p9, %p1070_p8 }
 0x5ab   :  { %p1073_p11 = pnand %p1072_p10, %p1066_p7 }
 0x5ad   :  { %1076 = shalt.err (!%p1073_p11)
}
 0x5ae   :  { %770 = dma.vmem_to_hbm [thread:$0]  %s768_s26, 32, %s1290_s8, [#allocation4]   ;;  %v755_v7 = vand.u32 127, %v283_v17 }
 0x5af   :  { %s1132_s12 = smov [#allocation16]  }
 0x5b0   :  { %vm757_vm10 = vcmp.eq.s32.totalorder %v755_v7, 1  ;;  %s787_s9 = sshll.u32 %s1132_s12, 4  ;;  %vm756_vm11 = vcmp.eq.s32.totalorder %v755_v7, 0  ;;  %s788_s9 = int_to_ptr.vmem [resolvable:$true] %s787_s9 }
 0x5b1   :  { %s1085_s13 = scalar_lea.vmem %s788_s9, 32  ;;  %p1090_p13 = scmp.lt.s32.totalorder %s788_s9, %s788_s9 }
 0x5b2   :  { %p1086_p12 = scmp.ne.s32.totalorder %s788_s9, %s1085_s13  ;;  %p1091_p0 = scmp.lt.s32.totalorder %s1085_s13, %s1085_s13 }
 0x5b4   :  { %p1092_p1 = por %p1091_p0, %p1090_p13 }
 0x5b6   :  { %p1093_p2 = pnand %p1092_p1, %p1086_p12 }
 0x62b   :  { %v746_v32 = vpop.xlane.xlu1 %745 }
 0x62c   :  { %v747_v33 = vmul.f32 -0.5, %v746_v32  ;;  %v752_v34 = vpop.xlane.xlu0 %751 }
 0x62d   :  { %v753_v35 = vmul.f32 -0.5, %v752_v34 }
 0x62f   :  { %v758_v36 = vsel %vm757_vm10, %v753_v35, 0.0 }
 0x630   :  { %v759_v37 = vsel %vm756_vm11, %v747_v33, %v758_v36 }
 0x631   :  { %760 = vst [vmem:[#allocation16] sm:$0x3] %v759_v37 }
 0x632   :  { %1096 = shalt.err (!%p1093_p2)
}
 0x633   :  { %790 = dma.vmem_to_hbm [thread:$0]  %s788_s9, 32, %s1292_s10, [#allocation15]  }
 0x634   :  { %1113 = dma.done.wait [#allocation4], 32  }
 0x635   :  { %1114 = vsyncadd [#allocation4], 4294967264 }
 0x636   :  { %1115 = dma.done.wait [#allocation15], 64  }
 0x637   :  { %1116 = vsyncadd [#allocation15], 4294967232 }
 0x638   :  { %800 = vsyncpa [#allocation3], 1 }
 0x639   :  { %801 = vsyncpa [#allocation6], 1 }
 0x63a   :  { %802 = vsyncpa [#allocation9], 1 }
 0x63b   :  { %803 = vsyncpa [#allocation12], 1 }
 0x63c   :  { %804 = vsyncpa [#allocation4], 1 }
 0x63d   :  { %805 = vsyncpa [#allocation15], 1 }

</bundles_post_ra>
